<compile_context>
chip_gen: v7x
topology: tpu7x:2x2x1
jax: 0.10.0
libtpu: 0.0.40
codegen_flags: <defaults>
</compile_context>

<pallas_src>
import jax
import jax.numpy as jnp
from jax import lax
from jax.experimental import pallas as pl
from jax.experimental.pallas import tpu as pltpu


def _patch_embed_kernel(patches_ref, w_ref, add_ref, out_ref):
    # patches_ref: (TM, K)   bf16  row tile of the flattened (batch*tokens) matrix
    # w_ref:       (K, Ep)   bf16  resident projection weight
    # add_ref:     (TM, Ep)  f32   resident per-token additive term (bias+pos / cls+pos)
    # out_ref:     (TM, Ep)  f32
    proj = jnp.dot(patches_ref[...], w_ref[...],
                   preferred_element_type=jnp.float32)      # MXU, f32 accumulate
    out_ref[...] = (proj + add_ref[...]).astype(out_ref.dtype)


def _round_up(a, b):
    return pl.cdiv(a, b) * b


def patch_embedding_forward(x, conv_w, conv_b, cls_token, pos_emb, patch_size,
                            *, target_rows=1024):
    """x: (B, C, H, W) f32 (NCHW).  conv_w: (E, C, ps, ps), conv_b: (E,),
    cls_token: (1, 1, E), pos_emb: (1, num_patches + 1, E).
    Returns (B, num_patches + 1, E) f32 (eval-mode forward; dropout is identity)."""
    B, C, H, W = x.shape
    E = conv_w.shape[0]
    ps = patch_size
    gh, gw = H // ps, W // ps
    P = gh * gw                       # num_patches
    K = C * ps * ps                   # per-patch feature size
    T = P + 1                         # tokens per batch element (cls + patches)

    T_pad = _round_up(T, 8)           # sublane-aligned token count
    E_pad = _round_up(E, 128)         # lane-dense output width

    # --- choose batches-per-tile so one row tile covers whole batch elements,
    # targeting >= target_rows rows while staying inside a conservative VMEM
    # budget (double-buffered streamed tiles + resident weight/add).
    def _tile_bytes(bt):
        tm = bt * T_pad
        return (2 * (tm * K * 2 + tm * E_pad * 4)      # patches in + out, 2x buffered
                + K * E_pad * 2 + tm * E_pad * 4)      # resident weight + add matrix
    vmem_budget = 40 * 1024 * 1024
    BT = max(1, min(B, target_rows // T_pad))
    while BT > 1 and _tile_bytes(BT) > vmem_budget:
        BT -= 1
    TM = BT * T_pad                   # rows per grid step (multiple of 8)
    B_pad = pl.cdiv(B, BT) * BT

    # --- glue: im2col in bf16 (halves the wrapper-side HBM traffic of the
    # transpose).  Token 0 of every batch element is a zero row (cls slot),
    # trailing rows up to T_pad and trailing batches up to B_pad are zeros.
    # TODO(synk): fuse patch extraction into the kernel with memory_space=pl.ANY
    # + make_async_copy of (C, ps, W) strips to remove this extra input copy.
    xb = x.astype(jnp.bfloat16)
    patches = xb.reshape(B, C, gh, ps, gw, ps)
    patches = patches.transpose(0, 2, 4, 1, 3, 5).reshape(B, P, K)
    patches_aug = jnp.pad(patches, ((0, B_pad - B), (1, T_pad - T), (0, 0)))
    patches_flat = patches_aug.reshape(B_pad * T_pad, K)

    # --- resident weight: conv weight (E, C, ps, ps) -> (K, E_pad) bf16.
    w_mat = conv_w.reshape(E, K).T.astype(jnp.bfloat16)
    w_mat = jnp.pad(w_mat, ((0, 0), (0, E_pad - E)))

    # --- resident additive matrix: row 0 = cls_token + pos[0];
    # rows 1..P = pos[1:] + conv bias; padding rows/cols = 0.  Tiled to TM rows
    # so a row tile covering BT batch elements adds it with a single VPU add.
    add = jnp.zeros((T_pad, E_pad), jnp.float32)
    add = add.at[0, :E].set(cls_token[0, 0] + pos_emb[0, 0])
    add = add.at[1:T, :E].set(pos_emb[0, 1:] + conv_b[None, :])
    add_tiled = jnp.tile(add, (BT, 1))                 # (TM, E_pad)

    grid = (B_pad // BT,)
    out_flat = pl.pallas_call(
        _patch_embed_kernel,
        out_shape=jax.ShapeDtypeStruct((B_pad * T_pad, E_pad), jnp.float32),
        grid_spec=pltpu.PrefetchScalarGridSpec(
            num_scalar_prefetch=0,
            grid=grid,
            in_specs=[
                pl.BlockSpec((TM, K), lambda i: (i, 0)),
                pl.BlockSpec((K, E_pad), lambda i: (0, 0)),     # resident weight
                pl.BlockSpec((TM, E_pad), lambda i: (0, 0)),    # resident add term
            ],
            out_specs=pl.BlockSpec((TM, E_pad), lambda i: (i, 0)),
        ),
        compiler_params=pltpu.CompilerParams(
            dimension_semantics=("parallel",),
            vmem_limit_bytes=48 * 1024 * 1024,
        ),
    )(patches_flat, w_mat, add_tiled)

    out = out_flat.reshape(B_pad, T_pad, E_pad)
    if (B_pad, T_pad, E_pad) != (B, T, E):
        out = out[:B, :T, :E]

    # TODO(synk): nn.Dropout — identity in eval mode; training-mode random
    # masking (pltpu.prng_*) not implemented here.
    return out


if __name__ == "__main__":
    # Small shapes consistent with the module:
    # batch=2, in_channels=4, image 16x16, patch_size=4 -> num_patches=16, embed_dim=32
    B, C, H, W = 2, 4, 16, 16
    ps = 4
    E = 32
    P = (H // ps) * (W // ps)

    key = jax.random.PRNGKey(0)
    kx, kw, kb, kc, kp = jax.random.split(key, 5)

    x = jax.random.normal(kx, (B, C, H, W), dtype=jnp.float32)
    conv_w = jax.random.normal(kw, (E, C, ps, ps), dtype=jnp.float32) * 0.05
    conv_b = jax.random.normal(kb, (E,), dtype=jnp.float32) * 0.05
    cls_token = jax.random.normal(kc, (1, 1, E), dtype=jnp.float32)
    pos_emb = jax.random.normal(kp, (1, P + 1, E), dtype=jnp.float32)

    out = patch_embedding_forward(x, conv_w, conv_b, cls_token, pos_emb, ps)
    out = jax.block_until_ready(out)
    assert out.shape == (B, P + 1, E), out.shape

    # Reference: same bf16 rounding of the matmul inputs, exact f32 accumulation.
    patches_ref = x.reshape(B, C, H // ps, ps, W // ps, ps)
    patches_ref = patches_ref.transpose(0, 2, 4, 1, 3, 5).reshape(B, P, C * ps * ps)
    pr = patches_ref.astype(jnp.bfloat16).astype(jnp.float32)
    wr = conv_w.reshape(E, -1).astype(jnp.bfloat16).astype(jnp.float32)
    proj = jnp.einsum("bpk,ek->bpe", pr, wr,
                      precision=lax.Precision.HIGHEST) + conv_b
    ref = jnp.concatenate([jnp.broadcast_to(cls_token, (B, 1, E)), proj], axis=1)
    ref = ref + pos_emb
    err = float(jnp.max(jnp.abs(out - ref)))
    assert jnp.allclose(out, ref, atol=2e-3, rtol=2e-3), err

    print("KERNEL_OK")
</pallas_src>

<mosaic_0001>
module attributes {stable_mosaic.version = 11 : i64} {
  func.func @_patch_embed_kernel(%arg0: i32, %arg1: memref<48x64xbf16, #tpu.memory_space<vmem>>, %arg2: memref<64x128xbf16, #tpu.memory_space<vmem>>, %arg3: memref<48x128xf32, #tpu.memory_space<vmem>>, %arg4: memref<48x128xf32, #tpu.memory_space<vmem>>) attributes {dimension_semantics = [#tpu.dimension_semantics<parallel>], iteration_bounds = array<i64: 1>, scalar_prefetch = 0 : i64, scratch_operands = 0 : i64, tpu.core_type = #tpu.core_type<tc>, window_params = [{transform_indices = @transform_0, window_bounds = array<i64: 48, 64>}, {pipeline_mode = #tpu.pipeline_mode<synchronous>, transform_indices = @transform_1, window_bounds = array<i64: 64, 128>}, {pipeline_mode = #tpu.pipeline_mode<synchronous>, transform_indices = @transform_2, window_bounds = array<i64: 48, 128>}, {transform_indices = @transform_3, window_bounds = array<i64: 48, 128>}]} {
    %c0 = arith.constant 0 : index
    %c0_0 = arith.constant 0 : index
    %0 = vector.load %arg1[%c0, %c0_0] : memref<48x64xbf16, #tpu.memory_space<vmem>>, vector<48x64xbf16>
    %c0_1 = arith.constant 0 : index
    %c0_2 = arith.constant 0 : index
    %1 = vector.load %arg2[%c0_1, %c0_2] : memref<64x128xbf16, #tpu.memory_space<vmem>>, vector<64x128xbf16>
    %cst = arith.constant dense<0.000000e+00> : vector<48x128xf32>
    %2 = tpu.matmul %0, %1, %cst {dimension_numbers = #tpu.dot_dimension_numbers<[1], [0], [0], [1], [0, 0, 1, 1], [], []>} : vector<48x64xbf16>, vector<64x128xbf16>, vector<48x128xf32> -> vector<48x128xf32>
    %c0_3 = arith.constant 0 : index
    %c0_4 = arith.constant 0 : index
    %3 = vector.load %arg3[%c0_3, %c0_4] : memref<48x128xf32, #tpu.memory_space<vmem>>, vector<48x128xf32>
    %4 = arith.addf %2, %3 : vector<48x128xf32>
    %c0_5 = arith.constant 0 : index
    %c0_6 = arith.constant 0 : index
    %5 = vector.load %arg4[%c0_5, %c0_6] : memref<48x128xf32, #tpu.memory_space<vmem>>, vector<48x128xf32>
    tpu.vector_store %arg4[%c0_5, %c0_6], %4 {strides = array<i32>} : memref<48x128xf32, #tpu.memory_space<vmem>>, vector<48x128xf32>,
    return
  }
  func.func @transform_0(%arg0: i32) -> (i32, i32) {
    %c0_i32 = arith.constant 0 : i32
    %c0_i32_0 = arith.constant 0 : i32
    return %arg0, %c0_i32 : i32, i32
  }
  func.func @transform_1(%arg0: i32) -> (i32, i32) {
    %c0_i32 = arith.constant 0 : i32
    %c0_i32_0 = arith.constant 0 : i32
    %c0_i32_1 = arith.constant 0 : i32
    return %c0_i32, %c0_i32_0 : i32, i32
  }
  func.func @transform_2(%arg0: i32) -> (i32, i32) {
    %c0_i32 = arith.constant 0 : i32
    %c0_i32_0 = arith.constant 0 : i32
    %c0_i32_1 = arith.constant 0 : i32
    return %c0_i32, %c0_i32_0 : i32, i32
  }
  func.func @transform_3(%arg0: i32) -> (i32, i32) {
    %c0_i32 = arith.constant 0 : i32
    %c0_i32_0 = arith.constant 0 : i32
    return %arg0, %c0_i32 : i32, i32
  }
}

</mosaic_0001>

<bundles_post_ra>
// kernel: tpu_custom_call.1
= control target key start
LH: loop header
LB: loop body
LE: loop exit
PB: predicated region body
PF: predicated region fallthrough
CT: control target
= control target key end

     0   :  { %8 = vsyncpa [#allocation3], 0  ;;  %s457_s0 = inlined_call_operand.hbm [shape: bf16[48,64], index: 0, kind: input, shape index: {}]   ;;  %s458_s1 = inlined_call_operand.hbm [shape: bf16[64,128], index: 1, kind: input, shape index: {}]   ;;  %s459_s2 = inlined_call_operand.hbm [shape: f32[48,128], index: 2, kind: input, shape index: {}]   ;;  %s460_s3 = inlined_call_operand.hbm [shape: f32[48,128], index: 3, kind: output, shape index: {}]  }
   0x1   :  { %9 = vsyncpa [#allocation6], 0 }
   0x2   :  { %10 = vsyncpa [#allocation4], 0  ;;  %s363_s12 = smov [#allocation5]   ;;  %s364_s14 = smov [#allocation2]  }
   0x3   :  { %s28_s13 = sshll.u32 %s363_s12, 4  ;;  %s16_s15 = sshll.u32 %s364_s14, 4  ;;  %s29_s13 = int_to_ptr.vmem [resolvable:$true] %s28_s13  ;;  %s393_s15 = int_to_ptr.vmem [resolvable:$true] %s16_s15 }
   0x4   :  { %s269_s18 = scalar_lea.hbm %s458_s1, 512 }
   0x5   :  { %p270_p0 = scmp.ne.s32.totalorder %s458_s1, %s269_s18  ;;  %p273_p1 = scmp.lt.u32.totalorder %s269_s18, %s458_s1 }
   0x7   :  { %p275_p2 = pnand %p273_p1, %p270_p0 }
   0x9   :  { %278 = shalt.err (!%p275_p2)
}
   0xa   :  { %s279_s23 = scalar_lea.vmem %s29_s13, 512  ;;  %p284_p4 = scmp.lt.s32.totalorder %s29_s13, %s29_s13 }
   0xb   :  { %p280_p3 = scmp.ne.s32.totalorder %s29_s13, %s279_s23  ;;  %p285_p5 = scmp.lt.s32.totalorder %s279_s23, %s279_s23 }
   0xd   :  { %p286_p6 = por %p285_p5, %p284_p4 }
   0xf   :  { %p287_p7 = pnand %p286_p6, %p280_p3 }
  0x11   :  { %290 = shalt.err (!%p287_p7)
}
  0x12   :  { %s365_s24 = smov 64   ;;  %s366_s25 = smov 4  }
  0x13   :  { %34 = dma.hbm_to_vmem [thread:$0]  %s458_s1, 512, %s29_s13, [#allocation6], %s365_s24, %s365_s24, %s366_s25  }
  0x14   :  { %s291_s30 = scalar_lea.hbm %s457_s0, 384 }
  0x15   :  { %p292_p8 = scmp.ne.s32.totalorder %s457_s0, %s291_s30  ;;  %p295_p9 = scmp.lt.u32.totalorder %s291_s30, %s457_s0 }
  0x17   :  { %p297_p10 = pnand %p295_p9, %p292_p8 }
  0x19   :  { %300 = shalt.err (!%p297_p10)
}
  0x1a   :  { %s301_s8 = scalar_lea.vmem %s393_s15, 384  ;;  %p306_p12 = scmp.lt.s32.totalorder %s393_s15, %s393_s15 }
  0x1b   :  { %p302_p11 = scmp.ne.s32.totalorder %s393_s15, %s301_s8  ;;  %p307_p13 = scmp.lt.s32.totalorder %s301_s8, %s301_s8 }
  0x1d   :  { %p308_p0 = por %p307_p13, %p306_p12 }
  0x1f   :  { %p309_p1 = pnand %p308_p0, %p302_p11 }
  0x21   :  { %312 = shalt.err (!%p309_p1)
}
  0x22   :  { %22 = dma.hbm_to_vmem [thread:$0]  %s457_s0, 384, %s393_s15, [#allocation3], %s365_s24, %s365_s24, %s366_s25  }
  0x23   :  { %s367_s10 = smov [#allocation7]   ;;  %s313_s14 = scalar_lea.hbm %s459_s2, 768 }
  0x24   :  { %s40_s11 = sshll.u32 %s367_s10, 4  ;;  %p314_p2 = scmp.ne.s32.totalorder %s459_s2, %s313_s14  ;;  %s41_s11 = int_to_ptr.vmem [resolvable:$true] %s40_s11 }
  0x25   :  { %p317_p3 = scmp.lt.u32.totalorder %s313_s14, %s459_s2 }
  0x27   :  { %p319_p4 = pnand %p317_p3, %p314_p2 }
  0x29   :  { %322 = shalt.err (!%p319_p4)
}
  0x2a   :  { %s323_s20 = scalar_lea.vmem %s41_s11, 768  ;;  %p328_p6 = scmp.lt.s32.totalorder %s41_s11, %s41_s11 }
  0x2b   :  { %p324_p5 = scmp.ne.s32.totalorder %s41_s11, %s323_s20  ;;  %p329_p7 = scmp.lt.s32.totalorder %s323_s20, %s323_s20 }
  0x2d   :  { %p330_p8 = por %p329_p7, %p328_p6 }
  0x2f   :  { %p331_p9 = pnand %p330_p8, %p324_p5 }
  0x31   :  { %334 = shalt.err (!%p331_p9)
}
  0x32   :  { %s368_s0 = smov 128   ;;  %s369_s15 = smov 8  }
  0x33   :  { %46 = dma.hbm_to_vmem [thread:$0]  %s459_s2, 768, %s41_s11, [#allocation6], %s368_s0, %s368_s0, %s369_s15  }
  0x34   :  { %357 = dma.done.wait [#allocation3], 384  }
  0x35   :  { %358 = vsyncadd [#allocation3], 4294966912 }
  0x36   :  { %359 = dma.done.wait [#allocation6], 1280  }
  0x37   :  { %360 = vsyncadd [#allocation6], 4294966016  ;;  %v370_v0 = vmov 0.0   ;;  %vm371_vm0 = vmmov 0   ;;  %v262_v1 = vld [vmem:[#allocation5] sm:$0xff]   ;;  %v263_v2 = vld [vmem:[#allocation5 + $0x8] sm:$0xff]  }
  0x38   :  { %244 = vmatprep.subr.bf16.mxu1 %v370_v0  ;;  %224 = vmatprep.subr.bf16.mxu0 %v370_v0  ;;  %v264_v3 = vld [vmem:[#allocation5 + $0x10] sm:$0xff]   ;;  %v265_v4 = vld [vmem:[#allocation5 + $0x18] sm:$0xff]   ;;  %v267_v6 = vld [vmem:[#allocation2] sm:$0xff]   ;;  %vm116_vm1 = vcmask 523264   ;;  %s372_s2 = smov [#allocation8]  }
  0x39   :  { %236 = vmatprep.mubr.msk.bf16.mxu1 %vm371_vm0, %v370_v0  ;;  %232 = vmatprep.mubr.msk.bf16.mxu0 %vm371_vm0, %v370_v0  ;;  %v266_v5 = vld [vmem:[#allocation2 + $0x8] sm:$0xff]   ;;  %v268_v7 = vld [vmem:[#allocation2 + $0x10] sm:$0xff]   ;;  %v71_v9 = vld [vmem:[#allocation7] sm:$0xff]  ;;  %s194_s23 = sshll.u32 %s372_s2, 4  ;;  %s195_s23 = int_to_ptr.vmem [resolvable:$true] %s194_s23 }
  0x3a   :  { %248 = vmatpush3.bf16.msra.mxu1 %v262_v1  ;;  %225 = vmatpush3.bf16.msra.mxu0 %v262_v1  ;;  %v73_v8 = vld [vmem:[#allocation7 + $0x10] sm:$0xff]  ;;  %v74_v11 = vld [vmem:[#allocation7 + $0x18] sm:$0xff]  ;;  %v72_v13 = vld [vmem:[#allocation7 + $0x8] sm:$0xff]  ;;  %s335_s24 = scalar_lea.vmem %s195_s23, 768  ;;  %p340_p11 = scmp.lt.s32.totalorder %s195_s23, %s195_s23 }
  0x3b   :  { %245 = vmatprep.subr.bf16.mxu1 %v370_v0  ;;  %226 = vmatprep.subr.bf16.mxu0 %v370_v0  ;;  %v75_v24 = vld [vmem:[#allocation7 + $0x20] sm:$0xff]  ;;  %v76_v26 = vld [vmem:[#allocation7 + $0x28] sm:$0xff]  ;;  %p336_p10 = scmp.ne.s32.totalorder %s195_s23, %s335_s24  ;;  %p341_p12 = scmp.lt.s32.totalorder %s335_s24, %s335_s24 }
  0x3d   :  { %p342_p13 = por %p341_p12, %p340_p11 }
  0x3e   :  { %249 = vmatpush3.bf16.msra.mxu1 %v263_v2  ;;  %227 = vmatpush3.bf16.msra.mxu0 %v263_v2 }
  0x3f   :  { %246 = vmatprep.subr.bf16.mxu1 %v370_v0  ;;  %228 = vmatprep.subr.bf16.mxu0 %v370_v0  ;;  %p343_p0 = pnand %p342_p13, %p336_p10 }
  0x42   :  { %250 = vmatpush3.bf16.msra.mxu1 %v264_v3  ;;  %229 = vmatpush3.bf16.msra.mxu0 %v264_v3 }
  0x43   :  { %247 = vmatprep.subr.bf16.mxu1 %v370_v0  ;;  %230 = vmatprep.subr.bf16.mxu0 %v370_v0 }
  0x46   :  { %251 = vmatpush3.bf16.msra.mxu1 %v265_v4  ;;  %231 = vmatpush3.bf16.msra.mxu0 %v265_v4 }
  0x49   :  { %237 = vmatmul.mubr.msk.bf16.vlgmr.msra.gmra.mrb[0].mxu1 %vm116_vm1, %v266_v5  ;;  %233 = vmatmul.mubr.msk.bf16.vlgmr.msra.gmra.mrb[0].mxu0 %vm116_vm1, %v267_v6 }
  0x4a   :  { %240 = vmatprep.mubr.msk.bf16.mxu1 %vm371_vm0, %v370_v0 }
  0x51   :  { %241 = vmatmul.mubr.msk.bf16.gmra.mrb[4].mxu1 %vm116_vm1, %v268_v7 }
 0x11c   :  { %v168_v10 = vpop.f32.mrb[0].mxu1  ;;  %v160_v12 = vpop.f32.mrb[0].mxu0 }
 0x11d   :  { %v169_v14 = vadd.f32 %v168_v10, %v73_v8  ;;  %v238_v15 = vpop.f32.mrb[1].mxu1  ;;  %v161_v16 = vadd.f32 %v160_v12, %v71_v9  ;;  %v234_v17 = vpop.f32.mrb[1].mxu0 }
 0x11e   :  { %v171_v18 = vpop.f32.mrb[2].mxu1  ;;  %v163_v19 = vpop.f32.mrb[2].mxu0 }
 0x11f   :  { %185 = vst [vmem:[#allocation8 + $0x10] sm:$0xff] %v169_v14  ;;  %v172_v20 = vadd.f32 %v171_v18, %v74_v11  ;;  %v239_v21 = vpop.f32.mrb[3].mxu1  ;;  %183 = vst [vmem:[#allocation8] sm:$0xff] %v161_v16  ;;  %v164_v22 = vadd.f32 %v163_v19, %v72_v13  ;;  %v235_v23 = vpop.f32.mrb[3].mxu0 }
 0x121   :  { %186 = vst [vmem:[#allocation8 + $0x18] sm:$0xff] %v172_v20  ;;  %184 = vst [vmem:[#allocation8 + $0x8] sm:$0xff] %v164_v22 }
 0x124   :  { %v176_v25 = vpop.f32.mrb[4].mxu1 }
 0x125   :  { %v177_v27 = vadd.f32 %v176_v25, %v75_v24  ;;  %v242_v28 = vpop.f32.mrb[5].mxu1 }
 0x126   :  { %v179_v29 = vpop.f32.mrb[6].mxu1 }
 0x127   :  { %187 = vst [vmem:[#allocation8 + $0x20] sm:$0xff] %v177_v27  ;;  %v180_v30 = vadd.f32 %v179_v29, %v76_v26  ;;  %v243_v31 = vpop.f32.mrb[7].mxu1 }
 0x129   :  { %188 = vst [vmem:[#allocation8 + $0x28] sm:$0xff] %v180_v30 }
 0x12a   :  { %346 = shalt.err (!%p343_p0)
}
 0x12b   :  { %s347_s27 = scalar_lea.hbm %s460_s3, 768 }
 0x12c   :  { %p348_p1 = scmp.ne.s32.totalorder %s460_s3, %s347_s27  ;;  %p351_p2 = scmp.lt.u32.totalorder %s347_s27, %s460_s3 }
 0x12e   :  { %p353_p3 = pnand %p351_p2, %p348_p1 }
 0x130   :  { %356 = shalt.err (!%p353_p3)
}
 0x131   :  { %200 = dma.vmem_to_hbm [thread:$0]  %s195_s23, 768, %s460_s3, [#allocation4], %s368_s0, %s368_s0, %s369_s15  }
 0x132   :  { %361 = dma.done.wait [#allocation4], 768  }
 0x133   :  { %362 = vsyncadd [#allocation4], 4294966528 }
 0x134   :  { %204 = vsyncpa [#allocation3], 1 }
 0x135   :  { %205 = vsyncpa [#allocation6], 1 }
 0x136   :  { %206 = vsyncpa [#allocation4], 1 }

</bundles_post_ra>
